<compile_context>
chip_gen: v6e
topology: v6e:2x2x1
jax: 0.10.0
libtpu: 0.0.40
codegen_flags: <defaults>
</compile_context>

<pallas_src>
import math
import functools

import jax
import jax.numpy as jnp
from jax.experimental import pallas as pl
from jax.experimental.pallas import tpu as pltpu


# ----------------------------- kernel ---------------------------------------

def pos_enc_kernel(x_ref, pe_ref, o_ref):
    """out = x + pe.   x_ref/o_ref: (TB, T*D);  pe_ref: (1, T*D) broadcast over rows."""
    o_ref[...] = x_ref[...] + pe_ref[...]
    # TODO(synk): training-mode Dropout(p) (pltpu.prng_seed +
    # pltpu.stateful_bernoulli mask + 1/(1-p) scale) not implemented;
    # eval-mode dropout is the identity, which this kernel matches.


# ----------------------------- wrapper --------------------------------------

def make_positional_encoding(d_model, max_len=10):
    """Sinusoidal buffer, identical to the torch module's __init__."""
    position = jnp.arange(max_len, dtype=jnp.float32)[:, None]            # (L, 1)
    div_term = jnp.exp(jnp.arange(0, d_model, 2, dtype=jnp.float32)
                       * (-math.log(10000.0) / d_model))                  # (D/2,)
    angles = position * div_term                                          # (L, D/2)
    pe = jnp.zeros((max_len, d_model), jnp.float32)
    pe = pe.at[:, 0::2].set(jnp.sin(angles))
    pe = pe.at[:, 1::2].set(jnp.cos(angles))
    return pe[None]                                                       # (1, L, D)


def _pick_block_rows(batch, row_bytes, target_tile_bytes=2 * 1024 * 1024):
    """Rows per grid step: ~2 MiB tiles (6 x tile stays well inside v7x's
    scoped-VMEM budget), the full batch when it is small, and a multiple of 8
    (sublane requirement for partial blocks) otherwise."""
    tb = max(1, target_tile_bytes // row_bytes)
    if tb >= batch or batch <= 8:
        return batch                      # full extent is always a legal block
    return max(8, (tb // 8) * 8)


@functools.partial(jax.jit, static_argnames=("block_rows",))
def positional_encoding_forward(x, pe, *, block_rows=None):
    """x: (B, T, D) batch-first (like the torch module).  pe: (1, max_len, D)."""
    B, T, D = x.shape
    TD = T * D

    # Lane-dense 2-D layout: last dim T*D instead of D (D=32 would leave 3/4
    # of every vreg and every vector store masked).
    x2 = x.reshape(B, TD)
    pe2 = pe[:, :T, :].reshape(1, TD)     # static slice + flatten, wrapper-side

    tb = block_rows if block_rows is not None else _pick_block_rows(B, TD * 4)
    grid = (pl.cdiv(B, tb),)

    tile_bytes = tb * TD * 4
    # x + out double-buffered (4 tiles) + resident pe + headroom; floor at the
    # 32 MiB scoped default, capped below v7x's 64 MiB physical VMEM.
    vmem_limit = int(min(64 * 1024 * 1024, max(32 * 1024 * 1024, 8 * tile_bytes)))

    out2 = pl.pallas_call(
        pos_enc_kernel,
        out_shape=jax.ShapeDtypeStruct((B, TD), x.dtype),
        grid=grid,
        in_specs=[
            pl.BlockSpec((tb, TD), lambda i: (i, 0)),   # x: streamed row tiles
            pl.BlockSpec((1, TD), lambda i: (0, 0)),    # pe: fetched once, VMEM-resident
        ],
        out_specs=pl.BlockSpec((tb, TD), lambda i: (i, 0)),
        input_output_aliases={0: 0},                    # write result in place of x
        compiler_params=pltpu.CompilerParams(
            dimension_semantics=("parallel",),          # shard row tiles across TCs (v7x)
            vmem_limit_bytes=vmem_limit,
        ),
        cost_estimate=pl.CostEstimate(
            flops=B * TD,
            transcendentals=0,
            bytes_accessed=4 * (2 * B * TD + TD),       # pe read exactly once
        ),
    )(x2, pe2)

    return out2.reshape(B, T, D)


# ----------------------------------- main ------------------------------------

if __name__ == "__main__":
    B, T, D_MODEL, MAX_LEN = 2, 8, 32, 10

    key = jax.random.PRNGKey(0)
    x = jax.random.normal(key, (B, T, D_MODEL), jnp.float32)
    pe = make_positional_encoding(D_MODEL, max_len=MAX_LEN)

    out = jax.block_until_ready(positional_encoding_forward(x, pe))
    assert out.shape == (B, T, D_MODEL), out.shape
    assert jnp.all(jnp.isfinite(out))
    ref = x + pe[:, :T, :]
    assert jnp.allclose(out, ref, atol=1e-6, rtol=1e-6)

    # Exercise the multi-step tiled path (grid > 1, resident pe, partial last
    # block) at a still-small shape.
    B2 = 20
    x_big = jax.random.normal(jax.random.PRNGKey(1), (B2, T, D_MODEL), jnp.float32)
    out_big = jax.block_until_ready(
        positional_encoding_forward(x_big, pe, block_rows=8))
    ref_big = x_big + pe[:, :T, :]
    assert out_big.shape == (B2, T, D_MODEL), out_big.shape
    assert jnp.allclose(out_big, ref_big, atol=1e-6, rtol=1e-6)

    print("KERNEL_OK")
</pallas_src>

<mosaic_0001>
module attributes {stable_mosaic.version = 11 : i64} {
  func.func @pos_enc_kernel(%arg0: i32, %arg1: memref<2x256xf32, #tpu.memory_space<vmem>>, %arg2: memref<1x256xf32, #tpu.memory_space<vmem>>, %arg3: memref<2x256xf32, #tpu.memory_space<vmem>>) attributes {dimension_semantics = [#tpu.dimension_semantics<parallel>], iteration_bounds = array<i64: 1>, scalar_prefetch = 0 : i64, scratch_operands = 0 : i64, tpu.core_type = #tpu.core_type<tc>, window_params = [{transform_indices = @transform_0, window_bounds = array<i64: 2, 256>}, {pipeline_mode = #tpu.pipeline_mode<synchronous>, transform_indices = @transform_1, window_bounds = array<i64: 1, 256>}, {transform_indices = @transform_2, window_bounds = array<i64: 2, 256>}]} {
    %c0 = arith.constant 0 : index
    %c0_0 = arith.constant 0 : index
    %0 = vector.load %arg1[%c0, %c0_0] : memref<2x256xf32, #tpu.memory_space<vmem>>, vector<2x256xf32>
    %c0_1 = arith.constant 0 : index
    %c0_2 = arith.constant 0 : index
    %1 = vector.load %arg2[%c0_1, %c0_2] : memref<1x256xf32, #tpu.memory_space<vmem>>, vector<1x256xf32>
    %2 = vector.broadcast %1 : vector<1x256xf32> to vector<2x256xf32>
    %3 = arith.addf %0, %2 : vector<2x256xf32>
    %c0_3 = arith.constant 0 : index
    %c0_4 = arith.constant 0 : index
    %4 = vector.load %arg3[%c0_3, %c0_4] : memref<2x256xf32, #tpu.memory_space<vmem>>, vector<2x256xf32>
    tpu.vector_store %arg3[%c0_3, %c0_4], %3 {strides = array<i32>} : memref<2x256xf32, #tpu.memory_space<vmem>>, vector<2x256xf32>,
    return
  }
  func.func @transform_0(%arg0: i32) -> (i32, i32) {
    %c0_i32 = arith.constant 0 : i32
    %c0_i32_0 = arith.constant 0 : i32
    return %arg0, %c0_i32 : i32, i32
  }
  func.func @transform_1(%arg0: i32) -> (i32, i32) {
    %c0_i32 = arith.constant 0 : i32
    %c0_i32_0 = arith.constant 0 : i32
    %c0_i32_1 = arith.constant 0 : i32
    return %c0_i32, %c0_i32_0 : i32, i32
  }
  func.func @transform_2(%arg0: i32) -> (i32, i32) {
    %c0_i32 = arith.constant 0 : i32
    %c0_i32_0 = arith.constant 0 : i32
    return %arg0, %c0_i32 : i32, i32
  }
}

</mosaic_0001>

<bundles_post_ra>
// kernel: positional_encoding_forward.1
= control target key start
LH: loop header
LB: loop body
LE: loop exit
PB: predicated region body
PF: predicated region fallthrough
CT: control target
= control target key end

     0   :  { %v14_v0 = vlaneseq  ;;  %v38_v1 = vmov 1983009808   ;;  %s63_s1 = inlined_call_operand.vmem [shape: f32[1,256], index: 1, kind: input, shape index: {}]   ;;  %s64_s0 = inlined_call_operand.vmem [shape: f32[2,256], index: 0, kind: input, shape index: {}, may-alias: {0,2}]   ;;  %s65_s2 = inlined_call_operand.vmem [shape: f32[2,256], index: 2, kind: output, shape index: {}, may-alias: {0,2}]  }
   0x1   :  { %v24_v2 = vunpack.c.l.s4 %v38_v1  ;;  %v12_v4 = vld [vmem:[%s63_s1] sm:$0x3] }
   0x2   :  { %v15_v3 = vshrl.u32 %v14_v0, 7  ;;  %v11_v12 = vld [vmem:[%s64_s0] sm:$0xf] }
   0x3   :  { %v25_v5 = vunpack.c.0.s8 %v24_v2 }
   0x4   :  { %v16_v6 = vsub.s32 0, %v15_v3  ;;  %v20_v7 = vsub.s32 1, %v15_v3 }
   0x5   :  { %v28_v10 = vsub.s32 %v25_v5, %v15_v3 }
   0x6   :  { %v17_v8 = vrot.slane %v12_v4, %v16_v6  ;;  %v21_v9 = vrot.slane %v12_v4, %v20_v7 }
   0x8   :  { %v22_v11 = vcombine.low %v17_v8, %v21_v9 }
   0xa   :  { %v29_v13 = vrot.slane %v22_v11, %v28_v10 }
   0xc   :  { %v31_v14 = vadd.f32 %v29_v13, %v11_v12 }
   0xe   :  { %32 = vst [vmem:[%s65_s2] sm:$0xf] %v31_v14 }

</bundles_post_ra>
